<compile_context>
chip_gen: v6e
topology: v6e:2x2x1
jax: 0.10.0
libtpu: 0.0.40
codegen_flags: <defaults>
</compile_context>

<pallas_src>
import jax
import jax.numpy as jnp
from jax.experimental import pallas as pl
from jax.experimental.pallas import tpu as pltpu

CONV_UNITS = 32
FC1_UNITS = 32
DROP_RATE = 0.1   # dropout is identity at inference; kept for documentation

LANE = 128        # TPU vreg lane width (last dim)
SUBLANE = 8       # TPU vreg sublane width (second-to-last dim)


def _round_up(n, m):
    return (n + m - 1) // m * m


def _cdiv(a, b):
    return (a + b - 1) // b


def myconvnet_kernel(xt_ref, wct_ref, bct_ref, w12t_ref, b12t_ref, ot_ref):
    # Batch-on-lanes math:  h^T = relu(Wc^T @ x^T + bc^T)
    # Conv1d(kernel_size=1, L=1) == Linear; Dropout(p=0.1) is identity in eval.
    h = jnp.dot(wct_ref[...], xt_ref[...],
                preferred_element_type=jnp.float32)          # [conv, tb] f32
    h = jnp.maximum(h + bct_ref[...], 0.0)                   # bias + ReLU (f32 VPU)
    # fc2(fc1(.)) folded into one matmul in the wrapper (exact at inference).
    o = jnp.dot(w12t_ref[...], h.astype(w12t_ref.dtype),
                preferred_element_type=jnp.float32) + b12t_ref[...]
    ot_ref[...] = o.astype(ot_ref.dtype)                     # [n_out, tb] lane-dense


def _prepare_params(params, compute_dtype):
    """Fold fc1+fc2, transpose for the batch-on-lanes layout, cast to bf16."""
    wc, bc, w1, b1, w2, b2 = params
    n_out = w2.shape[1]

    # Exact algebraic fold (dropout between fc1 and fc2 is identity at inference).
    w12 = w1 @ w2                                    # [conv, n_out], folded in f32
    b12 = b1 @ w2 + b2                               # [1, n_out]

    wct = wc.T.astype(compute_dtype)                 # [conv, n_in]   (bf16 MXU input)
    w12t = w12.T.astype(compute_dtype)               # [n_out, conv]  (bf16 MXU input)
    bct = bc.reshape(-1, 1).astype(jnp.float32)      # [conv, 1]      (f32 bias)
    b12t = b12.reshape(-1, 1).astype(jnp.float32)    # [n_out, 1]     (f32 bias)
    return wct, bct, w12t, b12t, n_out


def _choose_tb(B, batch_tile):
    """Lane-aligned batch tile; avoids near-empty tails, feeds 2 TCs on v7x."""
    if B <= 2 * LANE:
        return B                      # single full-dim block: no padding at all
    n_tiles = max(2, _cdiv(B, batch_tile))            # >=2 steps for v7x megacore
    tb = _round_up(_cdiv(B, n_tiles), LANE)           # split B as evenly as possible
    return min(tb, _round_up(B, LANE))


def myconvnet_forward(x, params, *, batch_tile=8192, compute_dtype=jnp.bfloat16):
    """x: [B, n_units_in] or [B, n_units_in, 1] (PyTorch layout).
    Returns [B, 1, n_units_out], matching output.view(-1, 1, n_units_out)."""
    if x.ndim == 3:                                   # [B, n_in, L=1]
        x = x.reshape(x.shape[0], -1)
    B, n_in = x.shape
    out_dtype = x.dtype

    wct, bct, w12t, b12t, n_out = _prepare_params(params, compute_dtype)

    # Batch-on-lanes activation.  (Producers should store x as [n_in, B] to
    # skip this transpose entirely.)
    xt = x.T.astype(compute_dtype)                    # [n_in, B]

    tb = _choose_tb(B, batch_tile)
    b_pad = _round_up(B, tb)
    if b_pad != B:                                    # pad batch only, by < tb cols
        xt = jnp.pad(xt, ((0, 0), (0, b_pad - B)))
    grid = (b_pad // tb,)

    cost = pl.CostEstimate(
        flops=2 * b_pad * (n_in * wct.shape[0] + wct.shape[0] * n_out),
        transcendentals=0,
        bytes_accessed=(xt.size * xt.dtype.itemsize
                        + n_out * b_pad * jnp.dtype(out_dtype).itemsize
                        + wct.size * wct.dtype.itemsize
                        + w12t.size * w12t.dtype.itemsize
                        + bct.size * 4 + b12t.size * 4),
    )

    ot = pl.pallas_call(
        myconvnet_kernel,
        out_shape=jax.ShapeDtypeStruct((n_out, b_pad), out_dtype),
        grid=grid,
        in_specs=[
            pl.BlockSpec((n_in, tb), lambda i: (0, i)),     # activations, lane-dense
            pl.BlockSpec(wct.shape, lambda i: (0, 0)),       # weights stay resident
            pl.BlockSpec(bct.shape, lambda i: (0, 0)),
            pl.BlockSpec(w12t.shape, lambda i: (0, 0)),
            pl.BlockSpec(b12t.shape, lambda i: (0, 0)),
        ],
        out_specs=pl.BlockSpec((n_out, tb), lambda i: (0, i)),   # lane-dense slab
        compiler_params=pltpu.CompilerParams(
            dimension_semantics=("parallel",),   # batch axis shards across TCs (v7x)
        ),
        cost_estimate=cost,
    )(xt, wct, bct, w12t, b12t)

    if b_pad != B:
        ot = ot[:, :B]
    return ot.T.reshape(B, 1, n_out)


def init_params(key, n_units_in, n_units_out, conv_units=CONV_UNITS, fc1_units=FC1_UNITS):
    """Deterministic synthetic parameters (shapes match the torch module,
    stored transposed: [in_features, out_features])."""
    ks = jax.random.split(key, 6)
    # Conv1d(n_in, conv, 1): torch weight [conv, n_in, 1] -> stored as [n_in, conv]
    wc = jax.random.normal(ks[0], (n_units_in, conv_units), jnp.float32) * 0.1
    bc = jax.random.normal(ks[1], (1, conv_units), jnp.float32) * 0.1
    # fc1: torch weight [fc1, conv] -> stored as [conv, fc1]
    w1 = jax.random.normal(ks[2], (conv_units, fc1_units), jnp.float32) * 0.1
    b1 = jax.random.normal(ks[3], (1, fc1_units), jnp.float32) * 0.1
    # fc2: torch weight [n_out, fc1] -> stored as [fc1, n_out]
    w2 = jax.random.normal(ks[4], (fc1_units, n_units_out), jnp.float32) * 0.1
    b2 = jax.random.normal(ks[5], (1, n_units_out), jnp.float32) * 0.1
    return (wc, bc, w1, b1, w2, b2)


if __name__ == "__main__":
    key = jax.random.PRNGKey(0)
    B, n_units_in, n_units_out = 8, 8, 4

    k_x, k_p = jax.random.split(key)
    x = jax.random.normal(k_x, (B, n_units_in), jnp.float32)
    params = init_params(k_p, n_units_in, n_units_out)

    out = myconvnet_forward(x, params)
    out = jax.block_until_ready(out)

    # Sanity check against a pure-JAX f32 reference of the ORIGINAL (unfused) math.
    wc, bc, w1, b1, w2, b2 = params
    ref = jnp.maximum(x @ wc + bc, 0.0) @ w1 + b1
    ref = (ref @ w2 + b2).reshape(B, 1, n_units_out)
    assert out.shape == (B, 1, n_units_out)
    # Kernel feeds bf16 into the MXU (f32 accumulation), so tolerance is loosened.
    assert jnp.allclose(out, ref, atol=2e-2, rtol=2e-2), "mismatch vs reference"

    print("KERNEL_OK")
</pallas_src>

<mosaic_0001>
module attributes {stable_mosaic.version = 11 : i64} {
  func.func @myconvnet_kernel(%arg0: i32, %arg1: memref<8x8xbf16, #tpu.memory_space<vmem>>, %arg2: memref<32x8xbf16, #tpu.memory_space<vmem>>, %arg3: memref<32x1xf32, #tpu.memory_space<vmem>>, %arg4: memref<4x32xbf16, #tpu.memory_space<vmem>>, %arg5: memref<4x1xf32, #tpu.memory_space<vmem>>, %arg6: memref<4x8xf32, #tpu.memory_space<vmem>>) attributes {dimension_semantics = [#tpu.dimension_semantics<parallel>], iteration_bounds = array<i64: 1>, scalar_prefetch = 0 : i64, scratch_operands = 0 : i64, tpu.core_type = #tpu.core_type<tc>, window_params = [{transform_indices = @transform_0, window_bounds = array<i64: 8, 8>}, {pipeline_mode = #tpu.pipeline_mode<synchronous>, transform_indices = @transform_1, window_bounds = array<i64: 32, 8>}, {pipeline_mode = #tpu.pipeline_mode<synchronous>, transform_indices = @transform_2, window_bounds = array<i64: 32, 1>}, {pipeline_mode = #tpu.pipeline_mode<synchronous>, transform_indices = @transform_3, window_bounds = array<i64: 4, 32>}, {pipeline_mode = #tpu.pipeline_mode<synchronous>, transform_indices = @transform_4, window_bounds = array<i64: 4, 1>}, {transform_indices = @transform_5, window_bounds = array<i64: 4, 8>}]} {
    %c0 = arith.constant 0 : index
    %c0_0 = arith.constant 0 : index
    %0 = vector.load %arg2[%c0, %c0_0] : memref<32x8xbf16, #tpu.memory_space<vmem>>, vector<32x8xbf16>
    %c0_1 = arith.constant 0 : index
    %c0_2 = arith.constant 0 : index
    %1 = vector.load %arg1[%c0_1, %c0_2] : memref<8x8xbf16, #tpu.memory_space<vmem>>, vector<8x8xbf16>
    %cst = arith.constant dense<0.000000e+00> : vector<32x8xf32>
    %2 = tpu.matmul %0, %1, %cst {dimension_numbers = #tpu.dot_dimension_numbers<[1], [0], [0], [1], [0, 0, 1, 1], [], []>} : vector<32x8xbf16>, vector<8x8xbf16>, vector<32x8xf32> -> vector<32x8xf32>
    %c0_3 = arith.constant 0 : index
    %c0_4 = arith.constant 0 : index
    %3 = vector.load %arg3[%c0_3, %c0_4] : memref<32x1xf32, #tpu.memory_space<vmem>>, vector<32x1xf32>
    %4 = vector.broadcast %3 : vector<32x1xf32> to vector<32x8xf32>
    %5 = arith.addf %2, %4 : vector<32x8xf32>
    %cst_5 = arith.constant 0.000000e+00 : f32
    %6 = vector.broadcast %cst_5 : f32 to vector<32x8xf32>
    %7 = arith.maximumf %5, %6 : vector<32x8xf32>
    %c0_6 = arith.constant 0 : index
    %c0_7 = arith.constant 0 : index
    %8 = vector.load %arg4[%c0_6, %c0_7] : memref<4x32xbf16, #tpu.memory_space<vmem>>, vector<4x32xbf16>
    %9 = arith.truncf %7 : vector<32x8xf32> to vector<32x8xbf16>
    %cst_8 = arith.constant dense<0.000000e+00> : vector<4x8xf32>
    %10 = tpu.matmul %8, %9, %cst_8 {dimension_numbers = #tpu.dot_dimension_numbers<[1], [0], [0], [1], [0, 0, 1, 1], [], []>} : vector<4x32xbf16>, vector<32x8xbf16>, vector<4x8xf32> -> vector<4x8xf32>
    %c0_9 = arith.constant 0 : index
    %c0_10 = arith.constant 0 : index
    %11 = vector.load %arg5[%c0_9, %c0_10] : memref<4x1xf32, #tpu.memory_space<vmem>>, vector<4x1xf32>
    %12 = vector.broadcast %11 : vector<4x1xf32> to vector<4x8xf32>
    %13 = arith.addf %10, %12 : vector<4x8xf32>
    %c0_11 = arith.constant 0 : index
    %c0_12 = arith.constant 0 : index
    %14 = vector.load %arg6[%c0_11, %c0_12] : memref<4x8xf32, #tpu.memory_space<vmem>>, vector<4x8xf32>
    tpu.vector_store %arg6[%c0_11, %c0_12], %13 {strides = array<i32>} : memref<4x8xf32, #tpu.memory_space<vmem>>, vector<4x8xf32>,
    return
  }
  func.func @transform_0(%arg0: i32) -> (i32, i32) {
    %c0_i32 = arith.constant 0 : i32
    %c0_i32_0 = arith.constant 0 : i32
    return %c0_i32, %arg0 : i32, i32
  }
  func.func @transform_1(%arg0: i32) -> (i32, i32) {
    %c0_i32 = arith.constant 0 : i32
    %c0_i32_0 = arith.constant 0 : i32
    %c0_i32_1 = arith.constant 0 : i32
    return %c0_i32, %c0_i32_0 : i32, i32
  }
  func.func @transform_2(%arg0: i32) -> (i32, i32) {
    %c0_i32 = arith.constant 0 : i32
    %c0_i32_0 = arith.constant 0 : i32
    %c0_i32_1 = arith.constant 0 : i32
    return %c0_i32, %c0_i32_0 : i32, i32
  }
  func.func @transform_3(%arg0: i32) -> (i32, i32) {
    %c0_i32 = arith.constant 0 : i32
    %c0_i32_0 = arith.constant 0 : i32
    %c0_i32_1 = arith.constant 0 : i32
    return %c0_i32, %c0_i32_0 : i32, i32
  }
  func.func @transform_4(%arg0: i32) -> (i32, i32) {
    %c0_i32 = arith.constant 0 : i32
    %c0_i32_0 = arith.constant 0 : i32
    %c0_i32_1 = arith.constant 0 : i32
    return %c0_i32, %c0_i32_0 : i32, i32
  }
  func.func @transform_5(%arg0: i32) -> (i32, i32) {
    %c0_i32 = arith.constant 0 : i32
    %c0_i32_0 = arith.constant 0 : i32
    return %c0_i32, %arg0 : i32, i32
  }
}

</mosaic_0001>

<bundles_post_ra>
// kernel: tpu_custom_call.1
= control target key start
LH: loop header
LB: loop body
LE: loop exit
PB: predicated region body
PF: predicated region fallthrough
CT: control target
= control target key end

     0   :  { %vm68_vm0 = vcmask 1043456   ;;  %vm61_vm1 = vcmask 64512   ;;  %v250_v5 = vmov 0   ;;  %s314_s0 = inlined_call_operand.vmem [shape: bf16[8,8], index: 0, kind: input, shape index: {}]   ;;  %s315_s1 = inlined_call_operand.vmem [shape: bf16[32,8], index: 1, kind: input, shape index: {}]   ;;  %s316_s2 = inlined_call_operand.vmem [shape: f32[32,1], index: 2, kind: input, shape index: {}]   ;;  %s317_s3 = inlined_call_operand.vmem [shape: bf16[4,32], index: 3, kind: input, shape index: {}]   ;;  %s318_s4 = inlined_call_operand.vmem [shape: f32[4,1], index: 4, kind: input, shape index: {}]   ;;  %s319_s5 = inlined_call_operand.hbm [shape: f32[4,8], index: 5, kind: output, shape index: {}]  }
   0x1   :  { %v26_v0 = vld [vmem:[%s314_s0] sm:$0xf]  ;;  %v227_v3 = vld [vmem:[%s315_s1 + $0x8] sm:$0xff]   ;;  %v29_v4 = vld [vmem:[%s316_s2 + $0x10] sm:$0xff]  ;;  %224 = vset.pattern.permute.xlu0 %v250_v5  ;;  %225 = vset.pattern.permute.xlu1 %v250_v5 }
   0x2   :  { %v226_v1 = vld [vmem:[%s315_s1] sm:$0xff]   ;;  %219 = vmatprep.subr.msk.bf16.mxu0 %vm68_vm0, %v26_v0  ;;  %v70_v2 = vsel %vm68_vm0, %v26_v0, 0  ;;  %43 = vperm.xlu0 %224, %v29_v4  }
   0x3   :  { %206 = vmatpush3.bf16.msra.mxu0 %v70_v2  ;;  %207 = vmatprep.mubr.msk.bf16.mxu0 %vm61_vm1, %v226_v1  ;;  %v27_v6 = vld [vmem:[%s316_s2] sm:$0xff] }
   0x4   :  { %33 = vperm.xlu1 %225, %v27_v6  }
   0x5   :  { %10 = vsyncpa [#allocation3], 0  ;;  %v30_v7 = vld [vmem:[%s316_s2 + $0x18] sm:$0xff]  ;;  %v28_v8 = vld [vmem:[%s316_s2 + $0x8] sm:$0xff]  ;;  %v251_v10 = vmov 0.0   ;;  %vm252_vm2 = vmmov 0  }
   0x6   :  { %208 = vmatmul.mubr.msk.bf16.vlgmr.msra.gmra.mxu0 %vm61_vm1, %v227_v3  ;;  %48 = vperm.xlu0 %224, %v30_v7   ;;  %v128_v9 = vld [vmem:[%s318_s4] sm:$0xf]  ;;  %vm134_vm3 = vcmask 261120   ;;  %s253_s7 = smov [#allocation2]   ;;  %vm178_vm4 = vcmask 60416  }
   0x7   :  { %211 = vmatprep.subr.bf16.mxu1 %v251_v10  ;;  %215 = vmatprep.mubr.msk.bf16.mxu1 %vm252_vm2, %v251_v10  ;;  %v125_v29 = vld [vmem:[%s317_s3] sm:$0x3]  ;;  %s186_s8 = sshll.u32 %s253_s7, 4  ;;  %s187_s8 = int_to_ptr.vmem [resolvable:$true] %s186_s8 }
   0x8   :  { %38 = vperm.xlu1 %225, %v28_v8   ;;  %s228_s9 = scalar_lea.vmem %s187_s8, 64  ;;  %p233_p1 = scmp.lt.s32.totalorder %s187_s8, %s187_s8 }
   0x9   :  { %p229_p0 = scmp.ne.s32.totalorder %s187_s8, %s228_s9  ;;  %p234_p2 = scmp.lt.s32.totalorder %s228_s9, %s228_s9 }
   0xa   :  { %131 = vperm.xlu0 %224, %v128_v9  }
   0xb   :  { %p235_p3 = por %p234_p2, %p233_p1 }
   0xd   :  { %p236_p4 = pnand %p235_p3, %p229_p0 }
  0x7d   :  { %v44_v11 = vpop.permute.xlu0 %43 }
  0x7f   :  { %v34_v12 = vpop.permute.xlu1 %33 }
  0x81   :  { %v49_v16 = vpop.permute.xlu0 %48 }
  0x83   :  { %v39_v19 = vpop.permute.xlu1 %38 }
  0x85   :  { %v132_v30 = vpop.permute.xlu0 %131 }
  0xc6   :  { %v209_v13 = vpop.f32.mrf.mxu0 }
  0xc7   :  { %v115_v15 = vadd.f32 %v209_v13, %v44_v11 }
  0xc8   :  { %v106_v14 = vpop.f32.mrf.mxu0 }
  0xc9   :  { %v123_v21 = vmax.f32 %v115_v15, 0.0  ;;  %v107_v22 = vadd.f32 %v106_v14, %v34_v12 }
  0xca   :  { %v210_v17 = vpop.f32.mrf.mxu0 }
  0xcb   :  { %v118_v18 = vadd.f32 %v210_v17, %v49_v16  ;;  %v121_v27 = vmax.f32 %v107_v22, 0.0 }
  0xcc   :  { %v109_v20 = vpop.f32.mrf.mxu0 }
  0xcd   :  { %v124_v23 = vmax.f32 %v118_v18, 0.0  ;;  %v110_v24 = vadd.f32 %v109_v20, %v39_v19 }
  0xcf   :  { %v122_v25 = vmax.f32 %v110_v24, 0.0  ;;  %v127_v26 = vpack.c.bf16 %v124_v23, %v123_v21 }
  0xd1   :  { %212 = vmatpush3.bf16.msra.mxu1 %v127_v26  ;;  %v126_v28 = vpack.c.bf16 %v122_v25, %v121_v27 }
  0xd2   :  { %213 = vmatprep.subr.bf16.mxu1 %v251_v10 }
  0xd5   :  { %214 = vmatpush3.bf16.msra.mxu1 %v126_v28 }
  0xd8   :  { %216 = vmatmul.mubr.msk.bf16.vlgmr.msra.gmra.mxu1 %vm134_vm3, %v125_v29 }
 0x198   :  { %v172_v31 = vpop.f32.mrf.mxu1 }
 0x199   :  { %v173_v32 = vadd.f32 %v172_v31, %v132_v30 }
 0x19a   :  { %v217_v33 = vpop.f32.mrf.mxu1 }
 0x19b   :  { %179 = vst.msk [vmem:[#allocation2] sm:$0xf] %vm178_vm4, %v173_v32 }
 0x19c   :  { %v175_v34 = vpop.f32.mrf.mxu1 }
 0x19d   :  { %239 = shalt.err (!%p236_p4)
}
 0x19e   :  { %189 = dma.vmem_to_hbm [thread:$0]  %s187_s8, 64, %s319_s5, [#allocation3]   ;;  %v218_v35 = vpop.f32.mrf.mxu1 }
 0x19f   :  { %248 = dma.done.wait [#allocation3], 64  }
 0x1a0   :  { %249 = vsyncadd [#allocation3], 4294967232 }
 0x1a1   :  { %193 = vsyncpa [#allocation3], 1 }

</bundles_post_ra>
